<compile_context>
chip_gen: v6e
topology: v6e:2x2x1
jax: 0.10.0
libtpu: 0.0.40
codegen_flags: <defaults>
</compile_context>

<pallas_src>
import math

import jax
import jax.numpy as jnp
from jax import lax
from jax.experimental import pallas as pl
from jax.experimental.pallas import tpu as pltpu


# --------------------------------------------------------------------------
# Pallas kernel: one batch element per grid step.
# --------------------------------------------------------------------------
def _expanding_block_kernel(uh_ref, w1f_ref, b1f_ref, w2sf_ref, w2xf_ref,
                            b2f_ref, w3f_ref, b3f_ref, x_ref, skip_ref, o_ref):
    # uh_ref  : (2H, H)              H-upsample (align_corners) matrix
    # x_ref   : (1, H, W*C)          input x, lane-flattened NHWC
    # skip_ref: (1, H1, W1*Cs)       cropped skip connection, lane-flattened
    # w1f_ref : (2, W*C,   W1*Co)    fused W-upsample + conv1, one per ky tap
    # w2sf_ref: (3, W1*Cs, W2o*Co)   conv2 tap matrices (skip channels)
    # w2xf_ref: (3, W1*Co, W2o*Co)   conv2 tap matrices (conv1-output channels)
    # w3f_ref : (3, W2o*Co, W3o*Co)  conv3 tap matrices
    # b*f_ref : (1, Wk*Co)           biases tiled over the flattened lane dim
    # o_ref   : (1, H3o, W3o*Co)     output, lane-flattened NHWC
    f32 = jnp.float32
    H1 = skip_ref.shape[1]          # rows after upsample + 2x2 conv1 (= 2H-1)
    H2o = H1 - 2                    # rows after conv2
    H3o = o_ref.shape[1]            # rows after conv3 (= H2o - 2)

    # 1) bilinear upsample along H (align_corners=True): one MXU matmul.
    #    t[i, (w, c)] = sum_h U_h[i, h] * x[h, w, c]
    t = jnp.dot(uh_ref[...], x_ref[0], preferred_element_type=f32)  # (2H, W*C)

    # 2) fused bilinear W-upsample + conv1 (2x2 valid): 2 tap matmuls + bias.
    #    (conv1 has no activation in the reference module.)
    y1 = jnp.dot(t[0:H1, :], w1f_ref[0], preferred_element_type=f32)
    y1 = y1 + jnp.dot(t[1:H1 + 1, :], w1f_ref[1], preferred_element_type=f32)
    y1 = y1 + b1f_ref[...]                                   # (H1, W1*Co)

    # 3) conv2 (3x3 valid) on concat([cropped skip, y1]) + ReLU.
    #    Concat folded away: conv2(cat) = conv2_skip(skip) + conv2_x(y1).
    skip = skip_ref[0]                                       # (H1, W1*Cs)
    acc2 = jnp.dot(skip[0:H2o, :], w2sf_ref[0], preferred_element_type=f32)
    for ky in range(1, 3):
        acc2 = acc2 + jnp.dot(skip[ky:ky + H2o, :], w2sf_ref[ky],
                              preferred_element_type=f32)
    for ky in range(3):
        acc2 = acc2 + jnp.dot(y1[ky:ky + H2o, :], w2xf_ref[ky],
                              preferred_element_type=f32)
    y2 = jnp.maximum(acc2 + b2f_ref[...], 0.0)               # (H2o, W2o*Co)

    # 4) conv3 (3x3 valid) + ReLU, stored as one lane-dense slab.
    acc3 = jnp.dot(y2[0:H3o, :], w3f_ref[0], preferred_element_type=f32)
    for ky in range(1, 3):
        acc3 = acc3 + jnp.dot(y2[ky:ky + H3o, :], w3f_ref[ky],
                              preferred_element_type=f32)
    o_ref[0] = jnp.maximum(acc3 + b3f_ref[...], 0.0).astype(o_ref.dtype)


# --------------------------------------------------------------------------
# Wrapper-side helpers (weight preprocessing + layout glue).
# --------------------------------------------------------------------------
def _upsample_matrix(n_in, n_out):
    """1-D interpolation matrix for nn.Upsample(bilinear, align_corners=True)."""
    pos = jnp.arange(n_out, dtype=jnp.float32) * (n_in - 1) / (n_out - 1)
    i0 = jnp.floor(pos).astype(jnp.int32)
    i1 = jnp.minimum(i0 + 1, n_in - 1)
    frac = pos - i0.astype(jnp.float32)
    rows = jnp.arange(n_out)
    m = jnp.zeros((n_out, n_in), jnp.float32)
    m = m.at[rows, i0].add(1.0 - frac)
    m = m.at[rows, i1].add(frac)
    return m


def _crop_nhwc(image, new_h, new_w):
    """NHWC translation of the PyTorch `crop` helper (center crop on H, W)."""
    plus_h = 1 if new_h % 2 != 0 else 0
    plus_w = 1 if new_w % 2 != 0 else 0
    mid_h = image.shape[1] // 2
    mid_w = image.shape[2] // 2
    go_h = new_h // 2
    go_w = new_w // 2
    return image[:, mid_h - go_h:mid_h + go_h + plus_h,
                 mid_w - go_w:mid_w + go_w + plus_w, :]


def expanding_block(skip_con_x, x, w1, b1, w2, b2, w3, b3):
    """ExpandingBlock forward.

    NHWC / HWIO layouts:
      x:          (N, H, W, C)
      skip_con_x: (N, Hs, Ws, Cs)      (Cs == C // 2 in a standard UNet)
      w1: (2, 2, C, Co)      b1: (Co,)      Co = C // 2
      w2: (3, 3, Cs+Co, Co)  b2: (Co,)
      w3: (3, 3, Co, Co)     b3: (Co,)
    returns (N, 2H-5, 2W-5, Co)
    """
    N, H, W, C = x.shape
    Cs = skip_con_x.shape[-1]
    Co = w1.shape[-1]
    assert w2.shape[2] == Cs + Co, "conv2 in-channels must equal Cs + C//2"

    H2, W2 = 2 * H, 2 * W             # after upsample
    H1, W1 = H2 - 1, W2 - 1           # after 2x2 conv1
    H2o, W2o = H1 - 2, W1 - 2         # after conv2
    H3o, W3o = H2o - 2, W2o - 2       # after conv3

    f32 = jnp.float32
    uh = _upsample_matrix(H, H2)                               # (2H, H)
    uw = _upsample_matrix(W, W2)                               # (2W, W)

    # Fuse W-upsample + conv1 kx taps into (W*C, W1*Co) matrices (one per ky).
    a = jnp.stack([uw[dx:dx + W1, :] for dx in range(2)])      # (2, W1, W)
    w1f = jnp.einsum('dqj,ydic->yjiqc', a, w1.astype(f32))
    w1f = w1f.reshape(2, W * C, W1 * Co)

    # conv2: split into skip / conv1-output parts; fold kx taps + channel
    # contraction into (W1*Cin, W2o*Co) tap matrices (one per ky).
    w2s, w2x = w2[:, :, :Cs, :], w2[:, :, Cs:, :]
    sel2 = jnp.stack([jnp.eye(W2o, W1, k=kx, dtype=f32) for kx in range(3)])
    w2sf = jnp.einsum('xrq,yxic->yqirc', sel2, w2s.astype(f32))
    w2sf = w2sf.reshape(3, W1 * Cs, W2o * Co)
    w2xf = jnp.einsum('xrq,yxic->yqirc', sel2, w2x.astype(f32))
    w2xf = w2xf.reshape(3, W1 * Co, W2o * Co)

    # conv3 tap matrices (W2o*Co, W3o*Co), one per ky.
    sel3 = jnp.stack([jnp.eye(W3o, W2o, k=kx, dtype=f32) for kx in range(3)])
    w3f = jnp.einsum('xrq,yxic->yqirc', sel3, w3.astype(f32))
    w3f = w3f.reshape(3, W2o * Co, W3o * Co)

    # Biases tiled along the flattened (width, channel) lane dim.
    b1f = jnp.tile(b1.astype(f32), W1).reshape(1, W1 * Co)
    b2f = jnp.tile(b2.astype(f32), W2o).reshape(1, W2o * Co)
    b3f = jnp.tile(b3.astype(f32), W3o).reshape(1, W3o * Co)

    # Lane-dense (rows, width*channels) activation slabs.
    x_flat = x.reshape(N, H, W * C)
    skip_flat = _crop_nhwc(skip_con_x, H1, W1).reshape(N, H1, W1 * Cs)

    out_flat = pl.pallas_call(
        _expanding_block_kernel,
        out_shape=jax.ShapeDtypeStruct((N, H3o, W3o * Co), x.dtype),
        grid=(N,),
        in_specs=[
            pl.BlockSpec((H2, H), lambda n: (0, 0)),
            pl.BlockSpec((2, W * C, W1 * Co), lambda n: (0, 0, 0)),
            pl.BlockSpec((1, W1 * Co), lambda n: (0, 0)),
            pl.BlockSpec((3, W1 * Cs, W2o * Co), lambda n: (0, 0, 0)),
            pl.BlockSpec((3, W1 * Co, W2o * Co), lambda n: (0, 0, 0)),
            pl.BlockSpec((1, W2o * Co), lambda n: (0, 0)),
            pl.BlockSpec((3, W2o * Co, W3o * Co), lambda n: (0, 0, 0)),
            pl.BlockSpec((1, W3o * Co), lambda n: (0, 0)),
            pl.BlockSpec((1, H, W * C), lambda n: (n, 0, 0)),
            pl.BlockSpec((1, H1, W1 * Cs), lambda n: (n, 0, 0)),
        ],
        out_specs=pl.BlockSpec((1, H3o, W3o * Co), lambda n: (n, 0, 0)),
        compiler_params=pltpu.CompilerParams(
            dimension_semantics=("parallel",),
            vmem_limit_bytes=64 * 1024 * 1024),
    )(uh, w1f, b1f, w2sf, w2xf, b2f, w3f, b3f, x_flat, skip_flat)

    return out_flat.reshape(N, H3o, W3o, Co)


# --------------------------------------------------------------------------
# Pure-JAX reference (mirrors the PyTorch forward, NHWC layout).
# --------------------------------------------------------------------------
def _bilinear_upsample_2x_ac(x):
    """NHWC bilinear upsample, scale 2, align_corners=True (PyTorch semantics)."""
    def axis_interp(arr, axis, n_in, n_out):
        pos = jnp.arange(n_out, dtype=jnp.float32) * (n_in - 1) / (n_out - 1)
        i0 = jnp.floor(pos).astype(jnp.int32)
        i1 = jnp.minimum(i0 + 1, n_in - 1)
        frac = pos - i0.astype(jnp.float32)
        a0 = jnp.take(arr, i0, axis=axis)
        a1 = jnp.take(arr, i1, axis=axis)
        shp = [1] * arr.ndim
        shp[axis] = n_out
        frac = frac.reshape(shp)
        return a0 * (1.0 - frac) + a1 * frac

    N, H, W, C = x.shape
    x = axis_interp(x, 1, H, 2 * H)
    x = axis_interp(x, 2, W, 2 * W)
    return x


def expanding_block_reference(skip_con_x, x, w1, b1, w2, b2, w3, b3):
    dn = ('NHWC', 'HWIO', 'NHWC')
    hi = lax.Precision.HIGHEST
    y = _bilinear_upsample_2x_ac(x)
    y = lax.conv_general_dilated(y, w1, (1, 1), 'VALID',
                                 dimension_numbers=dn, precision=hi)
    y = y + b1.reshape(1, 1, 1, -1)
    sc = _crop_nhwc(skip_con_x, y.shape[1], y.shape[2])
    y = jnp.concatenate([sc, y], axis=-1)
    y = lax.conv_general_dilated(y, w2, (1, 1), 'VALID',
                                 dimension_numbers=dn, precision=hi)
    y = jnp.maximum(y + b2.reshape(1, 1, 1, -1), 0.0)
    y = lax.conv_general_dilated(y, w3, (1, 1), 'VALID',
                                 dimension_numbers=dn, precision=hi)
    return jnp.maximum(y + b3.reshape(1, 1, 1, -1), 0.0)


if __name__ == "__main__":
    key = jax.random.PRNGKey(0)
    kx_, ks, k1, kb1, k2, kb2, k3, kb3 = jax.random.split(key, 8)

    N, C, H, W = 2, 8, 8, 8            # input_channels = 8
    Co = C // 2                        # 4 output channels
    Cs = C // 2                        # skip-connection channels
    Hs, Ws = 2 * H, 2 * W              # skip spatial size (contracting path)

    def u(k, shape, bound):
        return jax.random.uniform(k, shape, jnp.float32, -bound, bound)

    # Deterministic PyTorch-style uniform init (synthetic weights).
    bd1 = 1.0 / math.sqrt(C * 2 * 2)
    bd2 = 1.0 / math.sqrt((Cs + Co) * 3 * 3)
    bd3 = 1.0 / math.sqrt(Co * 3 * 3)
    w1, b1 = u(k1, (2, 2, C, Co), bd1), u(kb1, (Co,), bd1)
    w2, b2 = u(k2, (3, 3, Cs + Co, Co), bd2), u(kb2, (Co,), bd2)
    w3, b3 = u(k3, (3, 3, Co, Co), bd3), u(kb3, (Co,), bd3)

    x = jax.random.normal(kx_, (N, H, W, C), jnp.float32)
    skip = jax.random.normal(ks, (N, Hs, Ws, Cs), jnp.float32)

    out = expanding_block(skip, x, w1, b1, w2, b2, w3, b3)
    out = jax.block_until_ready(out)

    ref = expanding_block_reference(skip, x, w1, b1, w2, b2, w3, b3)
    assert out.shape == (N, 2 * H - 5, 2 * W - 5, Co), out.shape
    assert ref.shape == out.shape, (ref.shape, out.shape)
    max_err = float(jnp.max(jnp.abs(out - ref)))
    assert jnp.allclose(out, ref, rtol=1e-4, atol=1e-4), max_err
    print("KERNEL_OK")
</pallas_src>

<mosaic_0001>
module attributes {stable_mosaic.version = 11 : i64} {
  func.func @_expanding_block_kernel(%arg0: i32, %arg1: memref<16x8xf32, #tpu.memory_space<vmem>>, %arg2: memref<2x64x60xf32, #tpu.memory_space<vmem>>, %arg3: memref<1x60xf32, #tpu.memory_space<vmem>>, %arg4: memref<3x60x52xf32, #tpu.memory_space<vmem>>, %arg5: memref<3x60x52xf32, #tpu.memory_space<vmem>>, %arg6: memref<1x52xf32, #tpu.memory_space<vmem>>, %arg7: memref<3x52x44xf32, #tpu.memory_space<vmem>>, %arg8: memref<1x44xf32, #tpu.memory_space<vmem>>, %arg9: memref<1x8x64xf32, #tpu.memory_space<vmem>>, %arg10: memref<1x15x60xf32, #tpu.memory_space<vmem>>, %arg11: memref<1x11x44xf32, #tpu.memory_space<vmem>>) attributes {dimension_semantics = [#tpu.dimension_semantics<parallel>], iteration_bounds = array<i64: 2>, scalar_prefetch = 0 : i64, scratch_operands = 0 : i64, tpu.core_type = #tpu.core_type<tc>, window_params = [{pipeline_mode = #tpu.pipeline_mode<synchronous>, transform_indices = @transform_0, window_bounds = array<i64: 16, 8>}, {pipeline_mode = #tpu.pipeline_mode<synchronous>, transform_indices = @transform_1, window_bounds = array<i64: 2, 64, 60>}, {pipeline_mode = #tpu.pipeline_mode<synchronous>, transform_indices = @transform_2, window_bounds = array<i64: 1, 60>}, {pipeline_mode = #tpu.pipeline_mode<synchronous>, transform_indices = @transform_3, window_bounds = array<i64: 3, 60, 52>}, {pipeline_mode = #tpu.pipeline_mode<synchronous>, transform_indices = @transform_4, window_bounds = array<i64: 3, 60, 52>}, {pipeline_mode = #tpu.pipeline_mode<synchronous>, transform_indices = @transform_5, window_bounds = array<i64: 1, 52>}, {pipeline_mode = #tpu.pipeline_mode<synchronous>, transform_indices = @transform_6, window_bounds = array<i64: 3, 52, 44>}, {pipeline_mode = #tpu.pipeline_mode<synchronous>, transform_indices = @transform_7, window_bounds = array<i64: 1, 44>}, {transform_indices = @transform_8, window_bounds = array<i64: 1, 8, 64>}, {transform_indices = @transform_9, window_bounds = array<i64: 1, 15, 60>}, {transform_indices = @transform_10, window_bounds = array<i64: 1, 11, 44>}]} {
    %c0 = arith.constant 0 : index
    %c0_0 = arith.constant 0 : index
    %0 = vector.load %arg1[%c0, %c0_0] : memref<16x8xf32, #tpu.memory_space<vmem>>, vector<16x8xf32>
    %c0_1 = arith.constant 0 : index
    %c0_2 = arith.constant 0 : index
    %c0_3 = arith.constant 0 : index
    %1 = vector.load %arg9[%c0_1, %c0_2, %c0_3] : memref<1x8x64xf32, #tpu.memory_space<vmem>>, vector<1x8x64xf32>
    %2 = vector.shape_cast %1 : vector<1x8x64xf32> to vector<8x64xf32>
    %cst = arith.constant dense<0.000000e+00> : vector<16x64xf32>
    %3 = tpu.matmul %0, %2, %cst {dimension_numbers = #tpu.dot_dimension_numbers<[1], [0], [0], [1], [0, 0, 1, 1], [], []>} : vector<16x8xf32>, vector<8x64xf32>, vector<16x64xf32> -> vector<16x64xf32>
    %4 = vector.extract_strided_slice %3 {offsets = [0, 0], sizes = [15, 64], strides = [1, 1]} : vector<16x64xf32> to vector<15x64xf32>
    %c0_4 = arith.constant 0 : index
    %c0_5 = arith.constant 0 : index
    %c0_6 = arith.constant 0 : index
    %5 = vector.load %arg2[%c0_4, %c0_5, %c0_6] : memref<2x64x60xf32, #tpu.memory_space<vmem>>, vector<1x64x60xf32>
    %6 = vector.shape_cast %5 : vector<1x64x60xf32> to vector<64x60xf32>
    %cst_7 = arith.constant dense<0.000000e+00> : vector<15x60xf32>
    %7 = tpu.matmul %4, %6, %cst_7 {dimension_numbers = #tpu.dot_dimension_numbers<[1], [0], [0], [1], [0, 0, 1, 1], [], []>} : vector<15x64xf32>, vector<64x60xf32>, vector<15x60xf32> -> vector<15x60xf32>
    %8 = vector.extract_strided_slice %3 {offsets = [1, 0], sizes = [15, 64], strides = [1, 1]} : vector<16x64xf32> to vector<15x64xf32>
    %c1 = arith.constant 1 : index
    %c0_8 = arith.constant 0 : index
    %c0_9 = arith.constant 0 : index
    %9 = vector.load %arg2[%c1, %c0_8, %c0_9] : memref<2x64x60xf32, #tpu.memory_space<vmem>>, vector<1x64x60xf32>
    %10 = vector.shape_cast %9 : vector<1x64x60xf32> to vector<64x60xf32>
    %cst_10 = arith.constant dense<0.000000e+00> : vector<15x60xf32>
    %11 = tpu.matmul %8, %10, %cst_10 {dimension_numbers = #tpu.dot_dimension_numbers<[1], [0], [0], [1], [0, 0, 1, 1], [], []>} : vector<15x64xf32>, vector<64x60xf32>, vector<15x60xf32> -> vector<15x60xf32>
    %12 = arith.addf %7, %11 : vector<15x60xf32>
    %c0_11 = arith.constant 0 : index
    %c0_12 = arith.constant 0 : index
    %13 = vector.load %arg3[%c0_11, %c0_12] : memref<1x60xf32, #tpu.memory_space<vmem>>, vector<1x60xf32>
    %14 = vector.broadcast %13 : vector<1x60xf32> to vector<15x60xf32>
    %15 = arith.addf %12, %14 : vector<15x60xf32>
    %c0_13 = arith.constant 0 : index
    %c0_14 = arith.constant 0 : index
    %c0_15 = arith.constant 0 : index
    %16 = vector.load %arg10[%c0_13, %c0_14, %c0_15] : memref<1x15x60xf32, #tpu.memory_space<vmem>>, vector<1x15x60xf32>
    %17 = vector.shape_cast %16 : vector<1x15x60xf32> to vector<15x60xf32>
    %18 = vector.extract_strided_slice %17 {offsets = [0, 0], sizes = [13, 60], strides = [1, 1]} : vector<15x60xf32> to vector<13x60xf32>
    %c0_16 = arith.constant 0 : index
    %c0_17 = arith.constant 0 : index
    %c0_18 = arith.constant 0 : index
    %19 = vector.load %arg4[%c0_16, %c0_17, %c0_18] : memref<3x60x52xf32, #tpu.memory_space<vmem>>, vector<1x60x52xf32>
    %20 = vector.shape_cast %19 : vector<1x60x52xf32> to vector<60x52xf32>
    %cst_19 = arith.constant dense<0.000000e+00> : vector<13x52xf32>
    %21 = tpu.matmul %18, %20, %cst_19 {dimension_numbers = #tpu.dot_dimension_numbers<[1], [0], [0], [1], [0, 0, 1, 1], [], []>} : vector<13x60xf32>, vector<60x52xf32>, vector<13x52xf32> -> vector<13x52xf32>
    %22 = vector.extract_strided_slice %17 {offsets = [1, 0], sizes = [13, 60], strides = [1, 1]} : vector<15x60xf32> to vector<13x60xf32>
    %c1_20 = arith.constant 1 : index
    %c0_21 = arith.constant 0 : index
    %c0_22 = arith.constant 0 : index
    %23 = vector.load %arg4[%c1_20, %c0_21, %c0_22] : memref<3x60x52xf32, #tpu.memory_space<vmem>>, vector<1x60x52xf32>
    %24 = vector.shape_cast %23 : vector<1x60x52xf32> to vector<60x52xf32>
    %cst_23 = arith.constant dense<0.000000e+00> : vector<13x52xf32>
    %25 = tpu.matmul %22, %24, %cst_23 {dimension_numbers = #tpu.dot_dimension_numbers<[1], [0], [0], [1], [0, 0, 1, 1], [], []>} : vector<13x60xf32>, vector<60x52xf32>, vector<13x52xf32> -> vector<13x52xf32>
    %26 = arith.addf %21, %25 : vector<13x52xf32>
    %27 = vector.extract_strided_slice %17 {offsets = [2, 0], sizes = [13, 60], strides = [1, 1]} : vector<15x60xf32> to vector<13x60xf32>
    %c2 = arith.constant 2 : index
    %c0_24 = arith.constant 0 : index
    %c0_25 = arith.constant 0 : index
    %28 = vector.load %arg4[%c2, %c0_24, %c0_25] : memref<3x60x52xf32, #tpu.memory_space<vmem>>, vector<1x60x52xf32>
    %29 = vector.shape_cast %28 : vector<1x60x52xf32> to vector<60x52xf32>
    %cst_26 = arith.constant dense<0.000000e+00> : vector<13x52xf32>
    %30 = tpu.matmul %27, %29, %cst_26 {dimension_numbers = #tpu.dot_dimension_numbers<[1], [0], [0], [1], [0, 0, 1, 1], [], []>} : vector<13x60xf32>, vector<60x52xf32>, vector<13x52xf32> -> vector<13x52xf32>
    %31 = arith.addf %26, %30 : vector<13x52xf32>
    %32 = vector.extract_strided_slice %15 {offsets = [0, 0], sizes = [13, 60], strides = [1, 1]} : vector<15x60xf32> to vector<13x60xf32>
    %c0_27 = arith.constant 0 : index
    %c0_28 = arith.constant 0 : index
    %c0_29 = arith.constant 0 : index
    %33 = vector.load %arg5[%c0_27, %c0_28, %c0_29] : memref<3x60x52xf32, #tpu.memory_space<vmem>>, vector<1x60x52xf32>
    %34 = vector.shape_cast %33 : vector<1x60x52xf32> to vector<60x52xf32>
    %cst_30 = arith.constant dense<0.000000e+00> : vector<13x52xf32>
    %35 = tpu.matmul %32, %34, %cst_30 {dimension_numbers = #tpu.dot_dimension_numbers<[1], [0], [0], [1], [0, 0, 1, 1], [], []>} : vector<13x60xf32>, vector<60x52xf32>, vector<13x52xf32> -> vector<13x52xf32>
    %36 = arith.addf %31, %35 : vector<13x52xf32>
    %37 = vector.extract_strided_slice %15 {offsets = [1, 0], sizes = [13, 60], strides = [1, 1]} : vector<15x60xf32> to vector<13x60xf32>
    %c1_31 = arith.constant 1 : index
    %c0_32 = arith.constant 0 : index
    %c0_33 = arith.constant 0 : index
    %38 = vector.load %arg5[%c1_31, %c0_32, %c0_33] : memref<3x60x52xf32, #tpu.memory_space<vmem>>, vector<1x60x52xf32>
    %39 = vector.shape_cast %38 : vector<1x60x52xf32> to vector<60x52xf32>
    %cst_34 = arith.constant dense<0.000000e+00> : vector<13x52xf32>
    %40 = tpu.matmul %37, %39, %cst_34 {dimension_numbers = #tpu.dot_dimension_numbers<[1], [0], [0], [1], [0, 0, 1, 1], [], []>} : vector<13x60xf32>, vector<60x52xf32>, vector<13x52xf32> -> vector<13x52xf32>
    %41 = arith.addf %36, %40 : vector<13x52xf32>
    %42 = vector.extract_strided_slice %15 {offsets = [2, 0], sizes = [13, 60], strides = [1, 1]} : vector<15x60xf32> to vector<13x60xf32>
    %c2_35 = arith.constant 2 : index
    %c0_36 = arith.constant 0 : index
    %c0_37 = arith.constant 0 : index
    %43 = vector.load %arg5[%c2_35, %c0_36, %c0_37] : memref<3x60x52xf32, #tpu.memory_space<vmem>>, vector<1x60x52xf32>
    %44 = vector.shape_cast %43 : vector<1x60x52xf32> to vector<60x52xf32>
    %cst_38 = arith.constant dense<0.000000e+00> : vector<13x52xf32>
    %45 = tpu.matmul %42, %44, %cst_38 {dimension_numbers = #tpu.dot_dimension_numbers<[1], [0], [0], [1], [0, 0, 1, 1], [], []>} : vector<13x60xf32>, vector<60x52xf32>, vector<13x52xf32> -> vector<13x52xf32>
    %46 = arith.addf %41, %45 : vector<13x52xf32>
    %c0_39 = arith.constant 0 : index
    %c0_40 = arith.constant 0 : index
    %47 = vector.load %arg6[%c0_39, %c0_40] : memref<1x52xf32, #tpu.memory_space<vmem>>, vector<1x52xf32>
    %48 = vector.broadcast %47 : vector<1x52xf32> to vector<13x52xf32>
    %49 = arith.addf %46, %48 : vector<13x52xf32>
    %cst_41 = arith.constant 0.000000e+00 : f32
    %50 = vector.broadcast %cst_41 : f32 to vector<13x52xf32>
    %51 = arith.maximumf %49, %50 : vector<13x52xf32>
    %52 = vector.extract_strided_slice %51 {offsets = [0, 0], sizes = [11, 52], strides = [1, 1]} : vector<13x52xf32> to vector<11x52xf32>
    %c0_42 = arith.constant 0 : index
    %c0_43 = arith.constant 0 : index
    %c0_44 = arith.constant 0 : index
    %53 = vector.load %arg7[%c0_42, %c0_43, %c0_44] : memref<3x52x44xf32, #tpu.memory_space<vmem>>, vector<1x52x44xf32>
    %54 = vector.shape_cast %53 : vector<1x52x44xf32> to vector<52x44xf32>
    %cst_45 = arith.constant dense<0.000000e+00> : vector<11x44xf32>
    %55 = tpu.matmul %52, %54, %cst_45 {dimension_numbers = #tpu.dot_dimension_numbers<[1], [0], [0], [1], [0, 0, 1, 1], [], []>} : vector<11x52xf32>, vector<52x44xf32>, vector<11x44xf32> -> vector<11x44xf32>
    %56 = vector.extract_strided_slice %51 {offsets = [1, 0], sizes = [11, 52], strides = [1, 1]} : vector<13x52xf32> to vector<11x52xf32>
    %c1_46 = arith.constant 1 : index
    %c0_47 = arith.constant 0 : index
    %c0_48 = arith.constant 0 : index
    %57 = vector.load %arg7[%c1_46, %c0_47, %c0_48] : memref<3x52x44xf32, #tpu.memory_space<vmem>>, vector<1x52x44xf32>
    %58 = vector.shape_cast %57 : vector<1x52x44xf32> to vector<52x44xf32>
    %cst_49 = arith.constant dense<0.000000e+00> : vector<11x44xf32>
    %59 = tpu.matmul %56, %58, %cst_49 {dimension_numbers = #tpu.dot_dimension_numbers<[1], [0], [0], [1], [0, 0, 1, 1], [], []>} : vector<11x52xf32>, vector<52x44xf32>, vector<11x44xf32> -> vector<11x44xf32>
    %60 = arith.addf %55, %59 : vector<11x44xf32>
    %61 = vector.extract_strided_slice %51 {offsets = [2, 0], sizes = [11, 52], strides = [1, 1]} : vector<13x52xf32> to vector<11x52xf32>
    %c2_50 = arith.constant 2 : index
    %c0_51 = arith.constant 0 : index
    %c0_52 = arith.constant 0 : index
    %62 = vector.load %arg7[%c2_50, %c0_51, %c0_52] : memref<3x52x44xf32, #tpu.memory_space<vmem>>, vector<1x52x44xf32>
    %63 = vector.shape_cast %62 : vector<1x52x44xf32> to vector<52x44xf32>
    %cst_53 = arith.constant dense<0.000000e+00> : vector<11x44xf32>
    %64 = tpu.matmul %61, %63, %cst_53 {dimension_numbers = #tpu.dot_dimension_numbers<[1], [0], [0], [1], [0, 0, 1, 1], [], []>} : vector<11x52xf32>, vector<52x44xf32>, vector<11x44xf32> -> vector<11x44xf32>
    %65 = arith.addf %60, %64 : vector<11x44xf32>
    %c0_54 = arith.constant 0 : index
    %c0_55 = arith.constant 0 : index
    %66 = vector.load %arg8[%c0_54, %c0_55] : memref<1x44xf32, #tpu.memory_space<vmem>>, vector<1x44xf32>
    %67 = vector.broadcast %66 : vector<1x44xf32> to vector<11x44xf32>
    %68 = arith.addf %65, %67 : vector<11x44xf32>
    %cst_56 = arith.constant 0.000000e+00 : f32
    %69 = vector.broadcast %cst_56 : f32 to vector<11x44xf32>
    %70 = arith.maximumf %68, %69 : vector<11x44xf32>
    %c0_57 = arith.constant 0 : index
    %c0_58 = arith.constant 0 : index
    %c0_59 = arith.constant 0 : index
    %71 = vector.load %arg11[%c0_57, %c0_58, %c0_59] : memref<1x11x44xf32, #tpu.memory_space<vmem>>, vector<1x11x44xf32>
    %72 = vector.shape_cast %71 : vector<1x11x44xf32> to vector<11x44xf32>
    %73 = vector.shape_cast %70 : vector<11x44xf32> to vector<1x11x44xf32>
    tpu.vector_store %arg11[%c0_57, %c0_58, %c0_59], %73 {strides = array<i32>} : memref<1x11x44xf32, #tpu.memory_space<vmem>>, vector<1x11x44xf32>,
    return
  }
  func.func @transform_0(%arg0: i32) -> (i32, i32) {
    %c0_i32 = arith.constant 0 : i32
    %c0_i32_0 = arith.constant 0 : i32
    %c0_i32_1 = arith.constant 0 : i32
    return %c0_i32, %c0_i32_0 : i32, i32
  }
  func.func @transform_1(%arg0: i32) -> (i32, i32, i32) {
    %c0_i32 = arith.constant 0 : i32
    %c0_i32_0 = arith.constant 0 : i32
    %c0_i32_1 = arith.constant 0 : i32
    %c0_i32_2 = arith.constant 0 : i32
    return %c0_i32, %c0_i32_0, %c0_i32_1 : i32, i32, i32
  }
  func.func @transform_2(%arg0: i32) -> (i32, i32) {
    %c0_i32 = arith.constant 0 : i32
    %c0_i32_0 = arith.constant 0 : i32
    %c0_i32_1 = arith.constant 0 : i32
    return %c0_i32, %c0_i32_0 : i32, i32
  }
  func.func @transform_3(%arg0: i32) -> (i32, i32, i32) {
    %c0_i32 = arith.constant 0 : i32
    %c0_i32_0 = arith.constant 0 : i32
    %c0_i32_1 = arith.constant 0 : i32
    %c0_i32_2 = arith.constant 0 : i32
    return %c0_i32, %c0_i32_0, %c0_i32_1 : i32, i32, i32
  }
  func.func @transform_4(%arg0: i32) -> (i32, i32, i32) {
    %c0_i32 = arith.constant 0 : i32
    %c0_i32_0 = arith.constant 0 : i32
    %c0_i32_1 = arith.constant 0 : i32
    %c0_i32_2 = arith.constant 0 : i32
    return %c0_i32, %c0_i32_0, %c0_i32_1 : i32, i32, i32
  }
  func.func @transform_5(%arg0: i32) -> (i32, i32) {
    %c0_i32 = arith.constant 0 : i32
    %c0_i32_0 = arith.constant 0 : i32
    %c0_i32_1 = arith.constant 0 : i32
    return %c0_i32, %c0_i32_0 : i32, i32
  }
  func.func @transform_6(%arg0: i32) -> (i32, i32, i32) {
    %c0_i32 = arith.constant 0 : i32
    %c0_i32_0 = arith.constant 0 : i32
    %c0_i32_1 = arith.constant 0 : i32
    %c0_i32_2 = arith.constant 0 : i32
    return %c0_i32, %c0_i32_0, %c0_i32_1 : i32, i32, i32
  }
  func.func @transform_7(%arg0: i32) -> (i32, i32) {
    %c0_i32 = arith.constant 0 : i32
    %c0_i32_0 = arith.constant 0 : i32
    %c0_i32_1 = arith.constant 0 : i32
    return %c0_i32, %c0_i32_0 : i32, i32
  }
  func.func @transform_8(%arg0: i32) -> (i32, i32, i32) {
    %c0_i32 = arith.constant 0 : i32
    %c0_i32_0 = arith.constant 0 : i32
    %c0_i32_1 = arith.constant 0 : i32
    return %arg0, %c0_i32, %c0_i32_0 : i32, i32, i32
  }
  func.func @transform_9(%arg0: i32) -> (i32, i32, i32) {
    %c0_i32 = arith.constant 0 : i32
    %c0_i32_0 = arith.constant 0 : i32
    %c0_i32_1 = arith.constant 0 : i32
    return %arg0, %c0_i32, %c0_i32_0 : i32, i32, i32
  }
  func.func @transform_10(%arg0: i32) -> (i32, i32, i32) {
    %c0_i32 = arith.constant 0 : i32
    %c0_i32_0 = arith.constant 0 : i32
    %c0_i32_1 = arith.constant 0 : i32
    return %arg0, %c0_i32, %c0_i32_0 : i32, i32, i32
  }
}

</mosaic_0001>

<bundles_post_ra>
// kernel: tpu_custom_call.1
= control target key start
LH: loop header
LB: loop body
LE: loop exit
PB: predicated region body
PF: predicated region fallthrough
CT: control target
= control target key end

     0   :  { %s2092_s13 = smov 0   ;;  %s2453_s0 = inlined_call_operand.vmem [shape: f32[16,8], index: 0, kind: input, shape index: {}]   ;;  %s2454_s1 = inlined_call_operand.vmem [shape: f32[2,64,60], index: 1, kind: input, shape index: {}]   ;;  %s2455_s2 = inlined_call_operand.vmem [shape: f32[1,60], index: 2, kind: input, shape index: {}]   ;;  %s2456_s3 = inlined_call_operand.vmem [shape: f32[3,60,52], index: 3, kind: input, shape index: {}]   ;;  %s2457_s4 = inlined_call_operand.vmem [shape: f32[3,60,52], index: 4, kind: input, shape index: {}]   ;;  %s2458_s5 = inlined_call_operand.vmem [shape: f32[1,52], index: 5, kind: input, shape index: {}]   ;;  %s2459_s6 = inlined_call_operand.vmem [shape: f32[3,52,44], index: 6, kind: input, shape index: {}]   ;;  %s2460_s7 = inlined_call_operand.vmem [shape: f32[1,44], index: 7, kind: input, shape index: {}]   ;;  %s2461_s8 = inlined_call_operand.vmem [shape: f32[2,8,64], index: 8, kind: input, shape index: {}]   ;;  %s2462_s9 = inlined_call_operand.vmem [shape: f32[2,15,60], index: 9, kind: input, shape index: {}]   ;;  %s2463_s10 = inlined_call_operand.vmem [shape: f32[2,11,44], index: 10, kind: output, shape index: {}]  }
   0x1 LB: > { %s1599_s14 = sadd.s32 4294967295, %s2035_s13   ;;  %p1603_p0 = scmp.ge.s32.totalorder %s2035_s13, 1  ;;  %s2035_s13 = sphi %s2092_s13, %s20_s13  }
   0x2   : > { %p321_p1 = scmp.lt.s32.totalorder %s2035_s13, 3 }
   0x4   : > { %p322_p2 = pnand %p1603_p0, %p321_p1 }
   0x5   : > { %p363_p3 = scmp.lt.s32.totalorder (!%p322_p2), %s1599_s14, 1 }
   0x6   : > { %325 = sbr.rel (%p322_p2) target bundleno = 853 (0x355), region = 60 }
   0xb   : > { %v377_v0 = vld [vmem:[%s2453_s0] sm:$0xff]  ;;  %vm380_vm0 = vcmask 64512   ;;  %v1618_v1 = vld [vmem:[%s2454_s1 + $0x78] sm:$0xff]  ;;  %s2465_s14 = smov (!%p363_p3, %s1599_s14), 1  ;;  %v1617_v2 = vld [vmem:[%s2454_s1 + $0x70] sm:$0xff]  ;;  %vm682_vm1 = vcmask 1043456  }
   0xc   : > { %1815 = vmatprep.mubr.msk.f32.mxu0 %vm380_vm0, %v377_v0  ;;  %1818 = vmatprep.subr.mxu1 %v1618_v1  ;;  %v1616_v3 = vld [vmem:[%s2454_s1 + $0x68] sm:$0xff]  ;;  %s1604_s23 = sshll.u32 %s2465_s14, 3  ;;  %v1615_v4 = vld [vmem:[%s2454_s1 + $0x60] sm:$0xff]  ;;  %v469_v7 = vld [vmem:[%s2454_s1 + $0x38] sm:$0xff]  ;;  %vm485_vm2 = vcmask 523264   ;;  %vm481_vm3 = vcmask 1046528  }
   0xd   : > { %1819 = vmatpush3.msra.mxu1 %v1618_v1  ;;  %s366_s26 = scalar_lea.vmem %s2461_s8, %s1604_s23  ;;  %v378_v6 = vld [vmem:[%s2453_s0 + $0x8] sm:$0xff]  ;;  %v468_v8 = vld [vmem:[%s2454_s1 + $0x30] sm:$0xff]  ;;  %v1614_v9 = vld [vmem:[%s2454_s1 + $0x58] sm:$0xff]  ;;  %s1701_s23 = sshll.u32 %s2465_s14, 4  ;;  %vm677_vm4 = vcmask 490496   ;;  %vm852_vm5 = vcmask 1045504  }
   0xe   : > { %1820 = vmatprep.subr.mxu1 %v1617_v2  ;;  %v379_v5 = vld [vmem:[%s366_s26] sm:$0xff]  ;;  %v467_v10 = vld [vmem:[%s2454_s1 + $0x28] sm:$0xff]  ;;  %v465_v12 = vld [vmem:[%s2454_s1 + $0x18] sm:$0xff]  ;;  %s371_s26 = scalar_lea.vmem %s2462_s9, %s1701_s23  ;;  %vm1257_vm6 = vcmask 424960   ;;  %s376_s15 = scalar_lea.vmem %s2463_s10, %s1701_s23  ;;  %vm1530_vm7 = vcmask 354304   ;;  %vm1528_vm8 = vcmask 359424  }
   0xf   : > { %1821 = vmatpush3.msra.mxu1 %v1617_v2  ;;  %1813 = vmatprep.subr.mxu0 %v379_v5  ;;  %v466_v11 = vld [vmem:[%s2454_s1 + $0x20] sm:$0xff]  ;;  %v464_v13 = vld [vmem:[%s2454_s1 + $0x10] sm:$0xff]  ;;  %v463_v14 = vld [vmem:[%s2454_s1 + $0x8] sm:$0xff] }
  0x10   : > { %1822 = vmatprep.subr.mxu1 %v1616_v3  ;;  %1814 = vmatpush3.msra.mxu0 %v379_v5  ;;  %v1613_v15 = vld [vmem:[%s2454_s1 + $0x50] sm:$0xff]  ;;  %v462_v16 = vld [vmem:[%s2454_s1] sm:$0xff]  ;;  %v1612_v17 = vld [vmem:[%s2454_s1 + $0x48] sm:$0xff] }
  0x11   : > { %1823 = vmatpush3.msra.mxu1 %v1616_v3  ;;  %1816 = vmatmul.mubr.msk.f32.vlgmr.msra.gmra.mxu0 %vm380_vm0, %v378_v6  ;;  %v1611_v18 = vld [vmem:[%s2454_s1 + $0x40] sm:$0xff]  ;;  %v1631_v19 = vld [vmem:[%s2456_s3 + $0x78] sm:$0xf]  ;;  %v2178_v22 = vld [vmem:[%s371_s26 + $0x8] sm:$0x7f] }
  0x12   : > { %1824 = vmatprep.subr.mxu1 %v1615_v4  ;;  %1837 = vmatprep.subr.mxu0 %v469_v7  ;;  %v662_v20 = vld [vmem:[%s2456_s3 + $0x38] sm:$0xf]  ;;  %v2176_v21 = vld [vmem:[%s371_s26] sm:$0xff]  ;;  %v675_v25 = vrot.slane %v2178_v22, 1  ;;  %v661_v29 = vld [vmem:[%s2456_s3 + $0x30] sm:$0xff]  ;;  %v854_v45 = vrot.slane %v2178_v22, 2 }
  0x13   : > { %1838 = vmatpush3.msra.mxu0 %v469_v7  ;;  %1825 = vmatpush3.msra.mxu1 %v1615_v4  ;;  %v674_v24 = vrot.slane %v2176_v21, 1  ;;  %v1630_v32 = vld [vmem:[%s2456_s3 + $0x70] sm:$0xff]  ;;  %v660_v33 = vld [vmem:[%s2456_s3 + $0x28] sm:$0xff]  ;;  %v659_v35 = vld [vmem:[%s2456_s3 + $0x20] sm:$0xff]  ;;  %v853_v44 = vrot.slane %v2176_v21, 2 }
  0x14   : > { %1839 = vmatprep.subr.mxu0 %v468_v8  ;;  %1826 = vmatprep.subr.mxu1 %v1614_v9  ;;  %v1629_v34 = vld [vmem:[%s2456_s3 + $0x68] sm:$0xff]  ;;  %v1628_v36 = vld [vmem:[%s2456_s3 + $0x60] sm:$0xff]  ;;  %v658_v37 = vld [vmem:[%s2456_s3 + $0x18] sm:$0xff] }
  0x15   : > { %1840 = vmatpush3.msra.mxu0 %v468_v8  ;;  %1827 = vmatpush3.msra.mxu1 %v1614_v9  ;;  %v676_v31 = vsel %vm481_vm3, %v674_v24, %v675_v25  ;;  %v1627_v38 = vld [vmem:[%s2456_s3 + $0x58] sm:$0xff]  ;;  %v657_v39 = vld [vmem:[%s2456_s3 + $0x10] sm:$0xff]  ;;  %v656_v41 = vld [vmem:[%s2456_s3 + $0x8] sm:$0xff]  ;;  %v855_v49 = vsel %vm852_vm5, %v853_v44, %v854_v45 }
  0x16   : > { %1841 = vmatprep.subr.mxu0 %v467_v10  ;;  %1828 = vmatprep.subr.mxu1 %v1613_v15  ;;  %v1626_v40 = vld [vmem:[%s2456_s3 + $0x50] sm:$0xff]  ;;  %v1625_v42 = vld [vmem:[%s2456_s3 + $0x48] sm:$0xff]  ;;  %v655_v43 = vld [vmem:[%s2456_s3] sm:$0xff] }
  0x17   : > { %1842 = vmatpush3.msra.mxu0 %v467_v10  ;;  %1829 = vmatpush3.msra.mxu1 %v1613_v15  ;;  %v1624_v46 = vld [vmem:[%s2456_s3 + $0x40] sm:$0xff]  ;;  %v947_v47 = vld [vmem:[%s2457_s4 + $0x38] sm:$0xf]  ;;  %v1644_v50 = vld [vmem:[%s2456_s3 + $0xb0] sm:$0xff] }
  0x18   : > { %1843 = vmatprep.subr.mxu0 %v466_v11  ;;  %1830 = vmatprep.subr.mxu1 %v1612_v17  ;;  %v1645_v48 = vld [vmem:[%s2456_s3 + $0xb8] sm:$0xf]  ;;  %v946_v51 = vld [vmem:[%s2457_s4 + $0x30] sm:$0xff]  ;;  %v1643_v52 = vld [vmem:[%s2456_s3 + $0xa8] sm:$0xff] }
  0x19   : > { %1844 = vmatpush3.msra.mxu0 %v466_v11  ;;  %1831 = vmatpush3.msra.mxu1 %v1612_v17  ;;  %v945_v53 = vld [vmem:[%s2457_s4 + $0x28] sm:$0xff]  ;;  %v1642_v54 = vld [vmem:[%s2456_s3 + $0xa0] sm:$0xff]  ;;  %v1641_v55 = vld [vmem:[%s2456_s3 + $0x98] sm:$0xff] }
  0x1a   : > { %1845 = vmatprep.subr.mxu0 %v465_v12  ;;  %1832 = vmatprep.subr.mxu1 %v1611_v18  ;;  %v1640_v56 = vld [vmem:[%s2456_s3 + $0x90] sm:$0xff]  ;;  %v1639_v57 = vld [vmem:[%s2456_s3 + $0x88] sm:$0xff]  ;;  %v1638_v58 = vld [vmem:[%s2456_s3 + $0x80] sm:$0xff] }
  0x1b   : > { %1846 = vmatpush3.msra.mxu0 %v465_v12  ;;  %1833 = vmatpush3.msra.mxu1 %v1611_v18  ;;  %v1659_v59 = vld [vmem:[%s2457_s4 + $0x78] sm:$0xf]  ;;  %v944_v60 = vld [vmem:[%s2457_s4 + $0x20] sm:$0xff]  ;;  %v1658_v61 = vld [vmem:[%s2457_s4 + $0x70] sm:$0xff] }
  0x1c   : > { %1847 = vmatprep.subr.mxu0 %v464_v13  ;;  %1856 = vmatprep.subr.msk.mxu1 %vm682_vm1, %v1631_v19  ;;  %v943_v62 = vld [vmem:[%s2457_s4 + $0x18] sm:$0xff]  ;;  %v1657_v63 = vld [vmem:[%s2457_s4 + $0x68] sm:$0xff]  ;;  %v942_v0 = vld [vmem:[%s2457_s4 + $0x10] sm:$0xff] }
  0x1d   : > { %1848 = vmatpush3.msra.mxu0 %v464_v13  ;;  %v1656_v1 = vld [vmem:[%s2457_s4 + $0x60] sm:$0xff]  ;;  %v941_v2 = vld [vmem:[%s2457_s4 + $0x8] sm:$0xff]  ;;  %v1655_v3 = vld [vmem:[%s2457_s4 + $0x58] sm:$0xff] }
  0x1e   : > { %1849 = vmatprep.subr.mxu0 %v463_v14  ;;  %v940_v4 = vld [vmem:[%s2457_s4] sm:$0xff]  ;;  %v1654_v5 = vld [vmem:[%s2457_s4 + $0x50] sm:$0xff]  ;;  %v1653_v6 = vld [vmem:[%s2457_s4 + $0x48] sm:$0xff] }
  0x1f   : > { %1850 = vmatpush3.msra.mxu0 %v463_v14  ;;  %v1670_v7 = vld [vmem:[%s2457_s4 + $0xb8] sm:$0xf]  ;;  %v1652_v8 = vld [vmem:[%s2457_s4 + $0x40] sm:$0xff] }
  0x20   : > { %1851 = vmatprep.subr.mxu0 %v462_v16  ;;  %v1623_v11 = vld [vmem:[%s2455_s2] ss:$0 sm:$0xff]  ;;  %v1675_v44 = vld [vmem:[%s2459_s6 + $0x38] sm:$0xff] }
  0x21   : > { %1852 = vmatpush3.msra.mxu0 %v462_v16 }
  0x22   : > { %1875 = vmatprep.subr.msk.mxu0 %vm682_vm1, %v662_v20 }
  0xd1   : > { %v1817_v23 = vpop.f32.mrf.mxu0 }
  0xd2   : > { %v483_v27 = vrot.slane %v1817_v23, 1 }
  0xd3   : > { %v453_v26 = vpop.f32.mrf.mxu0 }
  0xd4   : > { %v482_v28 = vrot.slane %v453_v26, 1  ;;  %1853 = vmatprep.mubr.msk.f32.mxu0 %vm485_vm2, %v453_v26  ;;  %v1667_v26 = vld [vmem:[%s2457_s4 + $0xa0] sm:$0xff] }
  0xd5   : > { %1854 = vmatmul.mubr.msk.f32.vlgmr.msra.gmra.mxu0 %vm485_vm2, %v1817_v23 }
  0xd6   : > { %v484_v30 = vsel %vm481_vm3, %v482_v28, %v483_v27  ;;  %1876 = vmatpush3.msk.msra.mxu0 %vm682_vm1, %v662_v20  ;;  %1891 = vmatprep.mubr.msk.f32.mxu0 %vm677_vm4, %v2176_v21  ;;  %v1665_v28 = vld [vmem:[%s2457_s4 + $0x90] sm:$0xff] }
  0xd7   : > { %1834 = vmatprep.mubr.msk.f32.mxu1 %vm485_vm2, %v484_v30  ;;  %1877 = vmatprep.subr.mxu0 %v661_v29  ;;  %v1663_v30 = vld [vmem:[%s2457_s4 + $0x80] sm:$0xff] }
  0xd8   : > { %1835 = vmatmul.mubr.msk.f32.vlgmr.msra.gmra.mxu1 %vm485_vm2, %v483_v27  ;;  %1878 = vmatpush3.msra.mxu0 %v661_v29  ;;  %v1666_v27 = vld [vmem:[%s2457_s4 + $0x98] sm:$0xff]  ;;  %v1664_v29 = vld [vmem:[%s2457_s4 + $0x88] sm:$0xff] }
  0xd9   : > { %1857 = vmatpush3.msk.msra.mxu1 %vm682_vm1, %v1631_v19  ;;  %1872 = vmatprep.mubr.msk.f32.mxu1 %vm677_vm4, %v676_v31  ;;  %v1243_v31 = vld [vmem:[%s2459_s6 + $0x30] sm:$0xf] }
  0xda   : > { %1858 = vmatprep.subr.mxu1 %v1630_v32  ;;  %1879 = vmatprep.subr.mxu0 %v660_v33 }
  0xdb   : > { %1859 = vmatpush3.msra.mxu1 %v1630_v32  ;;  %1880 = vmatpush3.msra.mxu0 %v660_v33  ;;  %v1681_v32 = vld [vmem:[%s2459_s6 + $0x68] sm:$0xf] }
  0xdc   : > { %1860 = vmatprep.subr.mxu1 %v1629_v34  ;;  %1881 = vmatprep.subr.mxu0 %v659_v35  ;;  %v1242_v33 = vld [vmem:[%s2459_s6 + $0x28] sm:$0xff] }
  0xdd   : > { %1861 = vmatpush3.msra.mxu1 %v1629_v34  ;;  %1882 = vmatpush3.msra.mxu0 %v659_v35  ;;  %v1680_v34 = vld [vmem:[%s2459_s6 + $0x60] sm:$0xff] }
  0xde   : > { %1862 = vmatprep.subr.mxu1 %v1628_v36  ;;  %1883 = vmatprep.subr.mxu0 %v658_v37  ;;  %v1241_v35 = vld [vmem:[%s2459_s6 + $0x20] sm:$0xff] }
  0xdf   : > { %1863 = vmatpush3.msra.mxu1 %v1628_v36  ;;  %1884 = vmatpush3.msra.mxu0 %v658_v37  ;;  %v1679_v36 = vld [vmem:[%s2459_s6 + $0x58] sm:$0xff] }
  0xe0   : > { %1864 = vmatprep.subr.mxu1 %v1627_v38  ;;  %1885 = vmatprep.subr.mxu0 %v657_v39  ;;  %v1240_v37 = vld [vmem:[%s2459_s6 + $0x18] sm:$0xff] }
  0xe1   : > { %1865 = vmatpush3.msra.mxu1 %v1627_v38  ;;  %1886 = vmatpush3.msra.mxu0 %v657_v39  ;;  %v1678_v38 = vld [vmem:[%s2459_s6 + $0x50] sm:$0xff] }
  0xe2   : > { %1866 = vmatprep.subr.mxu1 %v1626_v40  ;;  %1887 = vmatprep.subr.mxu0 %v656_v41  ;;  %v1239_v39 = vld [vmem:[%s2459_s6 + $0x10] sm:$0xff] }
  0xe3   : > { %1867 = vmatpush3.msra.mxu1 %v1626_v40  ;;  %1888 = vmatpush3.msra.mxu0 %v656_v41  ;;  %v1677_v40 = vld [vmem:[%s2459_s6 + $0x48] sm:$0xff] }
  0xe4   : > { %1868 = vmatprep.subr.mxu1 %v1625_v42  ;;  %1889 = vmatprep.subr.mxu0 %v655_v43  ;;  %v1238_v41 = vld [vmem:[%s2459_s6 + $0x8] sm:$0xff] }
  0xe5   : > { %1869 = vmatpush3.msra.mxu1 %v1625_v42  ;;  %1890 = vmatpush3.msra.mxu0 %v655_v43  ;;  %v1676_v42 = vld [vmem:[%s2459_s6 + $0x40] sm:$0xff] }
  0xe6   : > { %1870 = vmatprep.subr.mxu1 %v1624_v46  ;;  %1892 = vmatmul.mubr.msk.f32.vlgmr.msra.gmra.mxu0 %vm677_vm4, %v2178_v22  ;;  %v1669_v22 = vld [vmem:[%s2457_s4 + $0xb0] sm:$0xff]  ;;  %v1237_v43 = vld [vmem:[%s2459_s6] sm:$0xff] }
  0xe7   : > { %1871 = vmatpush3.msra.mxu1 %v1624_v46  ;;  %1913 = vmatprep.subr.msk.mxu0 %vm682_vm1, %v947_v47 }
  0xe8   : > { %1894 = vmatprep.subr.msk.mxu1 %vm682_vm1, %v1645_v48  ;;  %1873 = vmatmul.mubr.msk.f32.vlgmr.msra.gmra.mxu1 %vm677_vm4, %v675_v25  ;;  %v1668_v25 = vld [vmem:[%s2457_s4 + $0xa8] sm:$0xff] }
  0xe9   : > { %1895 = vmatpush3.msk.msra.mxu1 %vm682_vm1, %v1645_v48  ;;  %1910 = vmatprep.mubr.msk.f32.mxu1 %vm677_vm4, %v855_v49 }
  0xea   : > { %1896 = vmatprep.subr.mxu1 %v1644_v50  ;;  %1914 = vmatpush3.msk.msra.mxu0 %vm682_vm1, %v947_v47 }
  0xeb   : > { %1897 = vmatpush3.msra.mxu1 %v1644_v50  ;;  %1915 = vmatprep.subr.mxu0 %v946_v51 }
  0xec   : > { %1898 = vmatprep.subr.mxu1 %v1643_v52  ;;  %1916 = vmatpush3.msra.mxu0 %v946_v51 }
  0xed   : > { %1899 = vmatpush3.msra.mxu1 %v1643_v52  ;;  %1917 = vmatprep.subr.mxu0 %v945_v53 }
  0xee   : > { %1900 = vmatprep.subr.mxu1 %v1642_v54  ;;  %1918 = vmatpush3.msra.mxu0 %v945_v53 }
  0xef   : > { %1901 = vmatpush3.msra.mxu1 %v1642_v54  ;;  %1919 = vmatprep.subr.mxu0 %v944_v60 }
  0xf0   : > { %1902 = vmatprep.subr.mxu1 %v1641_v55  ;;  %1920 = vmatpush3.msra.mxu0 %v944_v60 }
  0xf1   : > { %1903 = vmatpush3.msra.mxu1 %v1641_v55  ;;  %1921 = vmatprep.subr.mxu0 %v943_v62 }
  0xf2   : > { %1904 = vmatprep.subr.mxu1 %v1640_v56  ;;  %1922 = vmatpush3.msra.mxu0 %v943_v62 }
  0xf3   : > { %1905 = vmatpush3.msra.mxu1 %v1640_v56  ;;  %1923 = vmatprep.subr.mxu0 %v942_v0 }
  0xf4   : > { %1906 = vmatprep.subr.mxu1 %v1639_v57  ;;  %1924 = vmatpush3.msra.mxu0 %v942_v0  ;;  %v1674_v0 = vld [vmem:[%s2458_s5] ss:$0 sm:$0xff] }
  0xf5   : > { %1907 = vmatpush3.msra.mxu1 %v1639_v57  ;;  %1925 = vmatprep.subr.mxu0 %v941_v2 }
  0xf6   : > { %1908 = vmatprep.subr.mxu1 %v1638_v58  ;;  %1926 = vmatpush3.msra.mxu0 %v941_v2 }
  0xf7   : > { %1909 = vmatpush3.msra.mxu1 %v1638_v58  ;;  %1927 = vmatprep.subr.mxu0 %v940_v4 }
  0xf8   : > { %1911 = vmatmul.mubr.msk.f32.vlgmr.msra.gmra.mxu1 %vm677_vm4, %v854_v45  ;;  %1932 = vmatprep.subr.msk.mxu1 %vm682_vm1, %v1659_v59  ;;  %v1694_v45 = vld [vmem:[%s2459_s6 + $0xa0] sm:$0xf] }
  0xf9   : > { %1933 = vmatpush3.msk.msra.mxu1 %vm682_vm1, %v1659_v59  ;;  %1928 = vmatpush3.msra.mxu0 %v940_v4 }
  0xfa   : > { %1934 = vmatprep.subr.mxu1 %v1658_v61  ;;  %1951 = vmatprep.subr.msk.mxu0 %vm682_vm1, %v1670_v7 }
  0xfb   : > { %1935 = vmatpush3.msra.mxu1 %v1658_v61 }
  0xfc   : > { %1936 = vmatprep.subr.mxu1 %v1657_v63 }
  0xfd   : > { %1937 = vmatpush3.msra.mxu1 %v1657_v63 }
  0xfe   : > { %1938 = vmatprep.subr.mxu1 %v1656_v1 }
  0xff   : > { %1939 = vmatpush3.msra.mxu1 %v1656_v1 }
 0x100   : > { %1940 = vmatprep.subr.mxu1 %v1655_v3 }
 0x101   : > { %1941 = vmatpush3.msra.mxu1 %v1655_v3 }
 0x102   : > { %1942 = vmatprep.subr.mxu1 %v1654_v5 }
 0x103   : > { %1943 = vmatpush3.msra.mxu1 %v1654_v5 }
 0x104   : > { %1944 = vmatprep.subr.mxu1 %v1653_v6 }
 0x105   : > { %1945 = vmatpush3.msra.mxu1 %v1653_v6 }
 0x106   : > { %1946 = vmatprep.subr.mxu1 %v1652_v8 }
 0x107   : > { %1947 = vmatpush3.msra.mxu1 %v1652_v8 }
 0x108   : > { %1970 = vmatprep.subr.msk.mxu1 %vm682_vm1, %v1681_v32 }
 0x195   : > { %v1855_v9 = vpop.f32.mrf.mxu0 }
 0x197   : > { %v635_v13 = vpop.f32.mrf.mxu0 }
 0x198   : > { %v1836_v10 = vpop.f32.mrf.mxu1 }
 0x199   : > { %v641_v12 = vadd.f32 %v1855_v9, %v1836_v10 }
 0x19a   : > { %v556_v14 = vpop.f32.mrf.mxu1 }
 0x19b   : > { %v652_v15 = vadd.f32 %v1623_v11, %v641_v12  ;;  %v636_v16 = vadd.f32 %v635_v13, %v556_v14  ;;  %v1693_v14 = vld [vmem:[%s2459_s6 + $0x98] sm:$0xff] }
 0x19d   : > { %v651_v17 = vadd.f32 %v1623_v11, %v636_v16  ;;  %v1044_v18 = vrot.slane %v652_v15, 1  ;;  %v1140_v19 = vrot.slane %v652_v15, 2  ;;  %v1692_v16 = vld [vmem:[%s2459_s6 + $0x90] sm:$0xff] }
 0x19f   : > { %v1043_v20 = vrot.slane %v651_v17, 1  ;;  %v1139_v21 = vrot.slane %v651_v17, 2  ;;  %1929 = vmatprep.mubr.msk.f32.mxu0 %vm677_vm4, %v651_v17  ;;  %v1691_v17 = vld [vmem:[%s2459_s6 + $0x88] sm:$0xff] }
 0x1a0   : > { %1930 = vmatmul.mubr.msk.f32.vlgmr.msra.gmra.mxu0 %vm677_vm4, %v652_v15 }
 0x1a1   : > { %1952 = vmatpush3.msk.msra.mxu0 %vm682_vm1, %v1670_v7  ;;  %v1045_v23 = vsel %vm481_vm3, %v1043_v20, %v1044_v18  ;;  %v1141_v24 = vsel %vm852_vm5, %v1139_v21, %v1140_v19  ;;  %v1688_v20 = vld [vmem:[%s2459_s6 + $0x70] sm:$0xff] }
 0x1a2   : > { %1953 = vmatprep.subr.mxu0 %v1669_v22  ;;  %1948 = vmatprep.mubr.msk.f32.mxu1 %vm677_vm4, %v1045_v23 }
 0x1a3   : > { %1954 = vmatpush3.msra.mxu0 %v1669_v22  ;;  %1967 = vmatprep.mubr.msk.f32.mxu0 %vm677_vm4, %v1141_v24 }
 0x1a4   : > { %1949 = vmatmul.mubr.msk.f32.vlgmr.msra.gmra.mxu1 %vm677_vm4, %v1044_v18  ;;  %1955 = vmatprep.subr.mxu0 %v1668_v25  ;;  %v1690_v18 = vld [vmem:[%s2459_s6 + $0x80] sm:$0xff] }
 0x1a5   : > { %1956 = vmatpush3.msra.mxu0 %v1668_v25  ;;  %1971 = vmatpush3.msk.msra.mxu1 %vm682_vm1, %v1681_v32 }
 0x1a6   : > { %1957 = vmatprep.subr.mxu0 %v1667_v26  ;;  %1972 = vmatprep.subr.mxu1 %v1680_v34  ;;  %v1893_v48 = vpop.f32.mrf.mxu0 }
 0x1a7   : > { %1958 = vmatpush3.msra.mxu0 %v1667_v26  ;;  %1973 = vmatpush3.msra.mxu1 %v1680_v34 }
 0x1a8   : > { %1959 = vmatprep.subr.mxu0 %v1666_v27  ;;  %1974 = vmatprep.subr.mxu1 %v1679_v36  ;;  %v1874_v46 = vpop.f32.mrf.mxu1  ;;  %v834_v49 = vpop.f32.mrf.mxu0 }
 0x1a9   : > { %1960 = vmatpush3.msra.mxu0 %v1666_v27  ;;  %1975 = vmatpush3.msra.mxu1 %v1679_v36  ;;  %v840_v51 = vadd.f32 %v1893_v48, %v1874_v46  ;;  %v1698_v27 = vld [vmem:[%s2460_s7] ss:$0 sm:$0xff] }
 0x1aa   : > { %1961 = vmatprep.subr.mxu0 %v1665_v28  ;;  %1976 = vmatprep.subr.mxu1 %v1678_v38  ;;  %v752_v47 = vpop.f32.mrf.mxu1 }
 0x1ab   : > { %1962 = vmatpush3.msra.mxu0 %v1665_v28  ;;  %1977 = vmatpush3.msra.mxu1 %v1678_v38  ;;  %v835_v53 = vadd.f32 %v834_v49, %v752_v47 }
 0x1ac   : > { %1963 = vmatprep.subr.mxu0 %v1664_v29  ;;  %1978 = vmatprep.subr.mxu1 %v1677_v40 }
 0x1ad   : > { %1964 = vmatpush3.msra.mxu0 %v1664_v29  ;;  %1979 = vmatpush3.msra.mxu1 %v1677_v40 }
 0x1ae   : > { %1965 = vmatprep.subr.mxu0 %v1663_v30  ;;  %1980 = vmatprep.subr.mxu1 %v1676_v42 }
 0x1af   : > { %1966 = vmatpush3.msra.mxu0 %v1663_v30  ;;  %1981 = vmatpush3.msra.mxu1 %v1676_v42 }
 0x1b0   : > { %1968 = vmatmul.mubr.msk.f32.vlgmr.msra.gmra.mxu0 %vm677_vm4, %v1140_v19  ;;  %1987 = vmatprep.subr.msk.mxu0 %vm682_vm1, %v1243_v31  ;;  %v1689_v19 = vld [vmem:[%s2459_s6 + $0x78] sm:$0xff] }
 0x1b1   : > { %1988 = vmatpush3.msk.msra.mxu0 %vm682_vm1, %v1243_v31  ;;  %1982 = vmatprep.subr.mxu1 %v1675_v44 }
 0x1b2   : > { %1989 = vmatprep.subr.mxu0 %v1242_v33  ;;  %1983 = vmatpush3.msra.mxu1 %v1675_v44 }
 0x1b3   : > { %1990 = vmatpush3.msra.mxu0 %v1242_v33  ;;  %2004 = vmatprep.subr.msk.mxu1 %vm682_vm1, %v1694_v45 }
 0x1b4   : > { %1991 = vmatprep.subr.mxu0 %v1241_v35 }
 0x1b5   : > { %1992 = vmatpush3.msra.mxu0 %v1241_v35 }
 0x1b6   : > { %1993 = vmatprep.subr.mxu0 %v1240_v37 }
 0x1b7   : > { %1994 = vmatpush3.msra.mxu0 %v1240_v37 }
 0x1b8   : > { %1995 = vmatprep.subr.mxu0 %v1239_v39  ;;  %v1912_v50 = vpop.f32.mrf.mxu1 }
 0x1b9   : > { %1996 = vmatpush3.msra.mxu0 %v1239_v39  ;;  %v939_v55 = vadd.f32 %v1912_v50, %v840_v51 }
 0x1ba   : > { %1997 = vmatprep.subr.mxu0 %v1238_v41  ;;  %v929_v54 = vpop.f32.mrf.mxu1 }
 0x1bb   : > { %1998 = vmatpush3.msra.mxu0 %v1238_v41  ;;  %v938_v58 = vadd.f32 %v929_v54, %v835_v53 }
 0x1bc   : > { %1999 = vmatprep.subr.mxu0 %v1237_v43 }
 0x1bd   : > { %2000 = vmatpush3.msra.mxu0 %v1237_v43 }
 0x260   : > { %v1931_v52 = vpop.f32.mrf.mxu0 }
 0x261   : > { %v1033_v59 = vadd.f32 %v1931_v52, %v939_v55 }
 0x262   : > { %v1023_v56 = vpop.f32.mrf.mxu0 }
 0x263   : > { %v1032_v60 = vadd.f32 %v1023_v56, %v938_v58 }
 0x264   : > { %v1950_v57 = vpop.f32.mrf.mxu1 }
 0x265   : > { %v1129_v62 = vadd.f32 %v1950_v57, %v1033_v59 }
 0x266   : > { %v1119_v61 = vpop.f32.mrf.mxu1 }
 0x267   : > { %v1128_v1 = vadd.f32 %v1119_v61, %v1032_v60 }
 0x270   : > { %v1969_v63 = vpop.f32.mrf.mxu0 }
 0x271   : > { %v1225_v2 = vadd.f32 %v1969_v63, %v1129_v62 }
 0x272   : > { %v1215_v3 = vpop.f32.mrf.mxu0 }
 0x273   : > { %v1234_v4 = vadd.f32 %v1674_v0, %v1225_v2  ;;  %v1224_v5 = vadd.f32 %v1215_v3, %v1128_v1 }
 0x275   : > { %v1236_v6 = vmax.f32 %v1234_v4, 0.0  ;;  %v1233_v7 = vadd.f32 %v1674_v0, %v1224_v5 }
 0x277   : > { %v1235_v8 = vmax.f32 %v1233_v7, 0.0  ;;  %v1255_v9 = vrot.slane %v1236_v6, 1  ;;  %v1431_v12 = vrot.slane %v1236_v6, 2 }
 0x279   : > { %v1254_v10 = vrot.slane %v1235_v8, 1  ;;  %v1430_v11 = vrot.slane %v1235_v8, 2  ;;  %2001 = vmatprep.mubr.msk.f32.mxu0 %vm1257_vm6, %v1235_v8 }
 0x27a   : > { %2002 = vmatmul.mubr.msk.f32.vlgmr.msra.gmra.mxu0 %vm1257_vm6, %v1236_v6 }
 0x27b   : > { %v1256_v13 = vsel %vm481_vm3, %v1254_v10, %v1255_v9  ;;  %v1432_v15 = vsel %vm852_vm5, %v1430_v11, %v1431_v12 }
 0x27c   : > { %1984 = vmatprep.mubr.msk.f32.mxu1 %vm1257_vm6, %v1256_v13 }
 0x27d   : > { %1985 = vmatmul.mubr.msk.f32.vlgmr.msra.gmra.mxu1 %vm1257_vm6, %v1255_v9 }
 0x27e   : > { %2005 = vmatpush3.msk.msra.mxu1 %vm682_vm1, %v1694_v45  ;;  %2018 = vmatprep.mubr.msk.f32.mxu1 %vm1257_vm6, %v1432_v15 }
 0x27f   : > { %2006 = vmatprep.subr.mxu1 %v1693_v14 }
 0x280   : > { %2007 = vmatpush3.msra.mxu1 %v1693_v14 }
 0x281   : > { %2008 = vmatprep.subr.mxu1 %v1692_v16 }
 0x282   : > { %2009 = vmatpush3.msra.mxu1 %v1692_v16 }
 0x283   : > { %2010 = vmatprep.subr.mxu1 %v1691_v17 }
 0x284   : > { %2011 = vmatpush3.msra.mxu1 %v1691_v17 }
 0x285   : > { %2012 = vmatprep.subr.mxu1 %v1690_v18 }
 0x286   : > { %2013 = vmatpush3.msra.mxu1 %v1690_v18 }
 0x287   : > { %2014 = vmatprep.subr.mxu1 %v1689_v19 }
 0x288   : > { %2015 = vmatpush3.msra.mxu1 %v1689_v19 }
 0x289   : > { %2016 = vmatprep.subr.mxu1 %v1688_v20 }
 0x28a   : > { %2017 = vmatpush3.msra.mxu1 %v1688_v20 }
 0x28b   : > { %2019 = vmatmul.mubr.msk.f32.vlgmr.msra.gmra.mxu1 %vm1257_vm6, %v1431_v12 }
 0x33a   : > { %v2003_v22 = vpop.f32.mrf.mxu0 }
 0x33c   : > { %v1413_v25 = vpop.f32.mrf.mxu0 }
 0x33d   : > { %v1986_v21 = vpop.f32.mrf.mxu1 }
 0x33e   : > { %v1419_v24 = vadd.f32 %v2003_v22, %v1986_v21 }
 0x33f   : > { %v1331_v23 = vpop.f32.mrf.mxu1 }
 0x340   : > { %v1414_v28 = vadd.f32 %v1413_v25, %v1331_v23 }
 0x34b   : > { %v2020_v26 = vpop.f32.mrf.mxu1 }
 0x34c   : > { %v1516_v29 = vadd.f32 %v2020_v26, %v1419_v24 }
 0x34d   : > { %v1506_v30 = vpop.f32.mrf.mxu1 }
 0x34e   : > { %v1525_v31 = vadd.f32 %v1698_v27, %v1516_v29  ;;  %v1515_v32 = vadd.f32 %v1506_v30, %v1414_v28 }
 0x350   : > { %v1527_v33 = vmax.f32 %v1525_v31, 0.0  ;;  %v1524_v34 = vadd.f32 %v1698_v27, %v1515_v32 }
 0x352   : > { %1531 = vst.msk [vmem:[%s376_s15 + $0x8] sm:$0x7] %vm1530_vm7, %v1527_v33  ;;  %v1526_v35 = vmax.f32 %v1524_v34, 0.0 }
 0x354   : > { %1529 = vst.msk [vmem:[%s376_s15] sm:$0xff] %vm1528_vm8, %v1526_v35 }
 0x355 PF: > { %s20_s13 = sadd.s32 1, %s2035_s13  }
 0x356   : > { %p17_p4 = scmp.ge.s32.totalorder %s20_s13, 4  }
 0x358   :  { %19 = sbr.rel (!%p17_p4) target bundleno = 1 (0x1), region = 100 }

</bundles_post_ra>
